<compile_context>
chip_gen: v7x
topology: tpu7x:2x2x1
jax: 0.10.0
libtpu: 0.0.40
codegen_flags: <defaults>
</compile_context>

<pallas_src>
import jax
import jax.numpy as jnp
from jax.experimental import pallas as pl
from jax.experimental.pallas import tpu as pltpu

NUM_FTRS = 576  # MobileNetV3-Small: pretrained.classifier[0].in_features


def _round_up(x, m):
    return (x + m - 1) // m * m


def _hardswish(x):
    # x * relu6(x + 3) / 6   (kept in f32 on the VPU)
    return x * jnp.clip(x + 3.0, 0.0, 6.0) * (1.0 / 6.0)


def head_kernel(x_ref, w0_ref, w123_ref, b123_ref, out_ref):
    # classifier[0]: Linear(C, C, bias=False) -- bf16 MXU operands, f32 accumulation.
    h = jnp.dot(x_ref[...], w0_ref[...], preferred_element_type=jnp.float32)
    # classifier[1]: Hardswish ; classifier[2]: Dropout -> identity (eval mode).
    h = _hardswish(h)
    # classifier[3] @ extension[0] @ extension[1], folded offline into one (C, 1)
    # projection (exact -- no nonlinearity in that chain); kept in f32 for accuracy.
    out_ref[...] = (jnp.dot(h, w123_ref[...], preferred_element_type=jnp.float32)
                    + b123_ref[...])


def init_params(key, num_ftrs=NUM_FTRS):
    """Deterministic PyTorch-Linear-style init (uniform +-1/sqrt(fan_in)).
    Linear weights stored pre-transposed as (in_features, out_features)."""
    half = num_ftrs // 2
    ks = jax.random.split(key, 7)

    def u(k, shape, fan_in):
        bound = 1.0 / float(fan_in) ** 0.5
        return jax.random.uniform(k, shape, jnp.float32, -bound, bound)

    return dict(
        w0=u(ks[0], (num_ftrs, num_ftrs), num_ftrs),   # classifier[0], no bias
        w1=u(ks[1], (num_ftrs, half), num_ftrs),       # classifier[3]
        b1=u(ks[2], (1, half), num_ftrs),
        w2=u(ks[3], (half, 64), half),                 # extension[0]
        b2=u(ks[4], (1, 64), half),
        w3=u(ks[5], (64, 1), 64),                      # extension[1]
        b3=u(ks[6], (1, 1), 64),
    )


def prepare_head_params(p):
    """One-time weight fold + bf16 cast (hoisted out of the per-call path).

    Fold is exact: there is no nonlinearity between classifier[3], extension[0]
    and extension[1], so
        y = ((h @ w1 + b1) @ w2 + b2) @ w3 + b3 = h @ (w1 @ w2 @ w3) + b123.
    """
    w123 = p["w1"] @ p["w2"] @ p["w3"]                                  # (C, 1) f32
    b123 = p["b1"] @ p["w2"] @ p["w3"] + p["b2"] @ p["w3"] + p["b3"]    # (1, 1) f32
    return dict(
        w0=p["w0"].astype(jnp.bfloat16),   # bf16 MXU operand, halves weight DMA
        w123=w123,                         # tiny; keep f32 for accuracy
        b123=b123,
    )


def _choose_tile(n, max_tile):
    """Pick a batch tile balancing padding waste against per-grid-step overhead."""
    max_tile = max(8, _round_up(max_tile, 8))
    n8 = _round_up(n, 8)
    cands = {t for t in (64, 128, 256, 512, 1024) if t <= max_tile}
    cands.add(min(max_tile, n8))
    # ~0.35us fixed cost per grid step ~ DMA time of a few hundred pooled bf16 rows.
    overhead_rows = 256

    def cost(t):
        return _round_up(n, t) + overhead_rows * (-(-n // t))

    return min(sorted(cands), key=lambda t: (cost(t), -t))


def custom_mn_small_head(x_feat, hp, *, tile_b=512, core_parallel=False):
    """x_feat: (N, C, H, W) NCHW feature maps from the backbone. Returns (N, 1) f32.

    hp: output of prepare_head_params().
    core_parallel: set True on v7x (2 TensorCores) with >= 2 batch tiles to shard
    the batch grid axis across cores; default off for portability.
    """
    n, c, h, w = x_feat.shape

    # AdaptiveAvgPool2d(1) + flatten, hoisted out of the kernel: one fused XLA
    # reduction directly on the NCHW array (no transpose pass). f32 accumulate,
    # bf16 on the wire into the kernel.
    pooled = jnp.mean(x_feat, axis=(2, 3)).astype(jnp.bfloat16)   # (N, C) bf16

    tb = _choose_tile(n, tile_b)
    n_pad = _round_up(n, tb)
    if n_pad != n:
        pooled = jnp.pad(pooled, ((0, n_pad - n), (0, 0)))

    const = lambda i: (0, 0)
    sem = (pltpu.CORE_PARALLEL,) if core_parallel else ("parallel",)

    out = pl.pallas_call(
        head_kernel,
        out_shape=jax.ShapeDtypeStruct((n_pad, 1), jnp.float32),
        grid_spec=pltpu.PrefetchScalarGridSpec(
            num_scalar_prefetch=0,
            grid=(n_pad // tb,),
            in_specs=[
                pl.BlockSpec((tb, c), lambda i: (i, 0)),   # pooled activations (batch-tiled)
                pl.BlockSpec((c, c), const),               # w0    (resident, bf16)
                pl.BlockSpec((c, 1), const),               # w123  (folded projection)
                pl.BlockSpec((1, 1), const),               # b123
            ],
            out_specs=pl.BlockSpec((tb, 1), lambda i: (i, 0)),
        ),
        compiler_params=pltpu.CompilerParams(dimension_semantics=sem),
    )(pooled, hp["w0"], hp["w123"], hp["b123"])

    return out[:n]


def ref_forward(x_feat, p):
    """Pure-JAX f32 reference of the same head (un-folded, for verification)."""
    n, c, h, w = x_feat.shape
    pooled = x_feat.reshape(n, c, h * w).mean(axis=-1)
    z = pooled @ p["w0"]
    z = z * jnp.clip(z + 3.0, 0.0, 6.0) / 6.0
    z = z @ p["w1"] + p["b1"]
    z = z @ p["w2"] + p["b2"]
    return z @ p["w3"] + p["b3"]


if __name__ == "__main__":
    key = jax.random.PRNGKey(0)
    k_x, k_p = jax.random.split(key)

    # Small synthetic feature maps from the (not reproduced) backbone:
    # batch=2, channels=num_ftrs=576, spatial=4x4.
    x_feat = jax.random.normal(k_x, (2, NUM_FTRS, 4, 4), dtype=jnp.float32)
    params = init_params(k_p)
    head_params = prepare_head_params(params)   # fold + bf16 cast, once

    out = custom_mn_small_head(x_feat, head_params)
    out = jax.block_until_ready(out)

    ref = ref_forward(x_feat, params)
    assert out.shape == (2, 1), out.shape
    # bf16 MXU operands on the first GEMM -> loose tolerance vs the f32 reference.
    assert jnp.allclose(out, ref, atol=2e-2, rtol=2e-2), (out, ref)

    print("KERNEL_OK")
</pallas_src>

<mosaic_0001>
module attributes {stable_mosaic.version = 11 : i64} {
  func.func @head_kernel(%arg0: i32, %arg1: memref<8x576xbf16, #tpu.memory_space<vmem>>, %arg2: memref<576x576xbf16, #tpu.memory_space<vmem>>, %arg3: memref<576x1xf32, #tpu.memory_space<vmem>>, %arg4: memref<1x1xf32, #tpu.memory_space<vmem>>, %arg5: memref<8x1xf32, #tpu.memory_space<vmem>>) attributes {dimension_semantics = [#tpu.dimension_semantics<parallel>], iteration_bounds = array<i64: 1>, scalar_prefetch = 0 : i64, scratch_operands = 0 : i64, tpu.core_type = #tpu.core_type<tc>, window_params = [{transform_indices = @transform_0, window_bounds = array<i64: 8, 576>}, {pipeline_mode = #tpu.pipeline_mode<synchronous>, transform_indices = @transform_1, window_bounds = array<i64: 576, 576>}, {pipeline_mode = #tpu.pipeline_mode<synchronous>, transform_indices = @transform_2, window_bounds = array<i64: 576, 1>}, {pipeline_mode = #tpu.pipeline_mode<synchronous>, transform_indices = @transform_3, window_bounds = array<i64: 1, 1>}, {transform_indices = @transform_4, window_bounds = array<i64: 8, 1>}]} {
    %c0 = arith.constant 0 : index
    %c0_0 = arith.constant 0 : index
    %0 = vector.load %arg1[%c0, %c0_0] : memref<8x576xbf16, #tpu.memory_space<vmem>>, vector<8x576xbf16>
    %c0_1 = arith.constant 0 : index
    %c0_2 = arith.constant 0 : index
    %1 = vector.load %arg2[%c0_1, %c0_2] : memref<576x576xbf16, #tpu.memory_space<vmem>>, vector<576x576xbf16>
    %cst = arith.constant dense<0.000000e+00> : vector<8x576xf32>
    %2 = tpu.matmul %0, %1, %cst {dimension_numbers = #tpu.dot_dimension_numbers<[1], [0], [0], [1], [0, 0, 1, 1], [], []>} : vector<8x576xbf16>, vector<576x576xbf16>, vector<8x576xf32> -> vector<8x576xf32>
    %cst_3 = arith.constant 3.000000e+00 : f32
    %3 = vector.broadcast %cst_3 : f32 to vector<8x576xf32>
    %4 = arith.addf %2, %3 : vector<8x576xf32>
    %cst_4 = arith.constant 0.000000e+00 : f32
    %cst_5 = arith.constant 6.000000e+00 : f32
    %5 = vector.broadcast %cst_4 : f32 to vector<8x576xf32>
    %6 = arith.maximumf %5, %4 : vector<8x576xf32>
    %7 = vector.broadcast %cst_5 : f32 to vector<8x576xf32>
    %8 = arith.minimumf %7, %6 : vector<8x576xf32>
    %9 = arith.mulf %2, %8 : vector<8x576xf32>
    %cst_6 = arith.constant 0.166666672 : f32
    %10 = vector.broadcast %cst_6 : f32 to vector<8x576xf32>
    %11 = arith.mulf %9, %10 : vector<8x576xf32>
    %c0_7 = arith.constant 0 : index
    %c0_8 = arith.constant 0 : index
    %12 = vector.load %arg3[%c0_7, %c0_8] : memref<576x1xf32, #tpu.memory_space<vmem>>, vector<576x1xf32>
    %cst_9 = arith.constant dense<0.000000e+00> : vector<8x1xf32>
    %13 = tpu.matmul %11, %12, %cst_9 {dimension_numbers = #tpu.dot_dimension_numbers<[1], [0], [0], [1], [0, 0, 1, 1], [], []>} : vector<8x576xf32>, vector<576x1xf32>, vector<8x1xf32> -> vector<8x1xf32>
    %c0_10 = arith.constant 0 : index
    %c0_11 = arith.constant 0 : index
    %14 = vector.load %arg4[%c0_10, %c0_11] : memref<1x1xf32, #tpu.memory_space<vmem>>, vector<1x1xf32>
    %15 = vector.broadcast %14 : vector<1x1xf32> to vector<8x1xf32>
    %16 = arith.addf %13, %15 : vector<8x1xf32>
    %c0_12 = arith.constant 0 : index
    %c0_13 = arith.constant 0 : index
    %17 = vector.load %arg5[%c0_12, %c0_13] : memref<8x1xf32, #tpu.memory_space<vmem>>, vector<8x1xf32>
    tpu.vector_store %arg5[%c0_12, %c0_13], %16 {strides = array<i32>} : memref<8x1xf32, #tpu.memory_space<vmem>>, vector<8x1xf32>,
    return
  }
  func.func @transform_0(%arg0: i32) -> (i32, i32) {
    %c0_i32 = arith.constant 0 : i32
    %c0_i32_0 = arith.constant 0 : i32
    return %arg0, %c0_i32 : i32, i32
  }
  func.func @transform_1(%arg0: i32) -> (i32, i32) {
    %c0_i32 = arith.constant 0 : i32
    %c0_i32_0 = arith.constant 0 : i32
    %c0_i32_1 = arith.constant 0 : i32
    return %c0_i32, %c0_i32_0 : i32, i32
  }
  func.func @transform_2(%arg0: i32) -> (i32, i32) {
    %c0_i32 = arith.constant 0 : i32
    %c0_i32_0 = arith.constant 0 : i32
    %c0_i32_1 = arith.constant 0 : i32
    return %c0_i32, %c0_i32_0 : i32, i32
  }
  func.func @transform_3(%arg0: i32) -> (i32, i32) {
    %c0_i32 = arith.constant 0 : i32
    %c0_i32_0 = arith.constant 0 : i32
    %c0_i32_1 = arith.constant 0 : i32
    return %c0_i32, %c0_i32_0 : i32, i32
  }
  func.func @transform_4(%arg0: i32) -> (i32, i32) {
    %c0_i32 = arith.constant 0 : i32
    %c0_i32_0 = arith.constant 0 : i32
    return %arg0, %c0_i32 : i32, i32
  }
}

</mosaic_0001>

<bundles_post_ra>
// kernel: tpu_custom_call.1
= control target key start
LH: loop header
LB: loop body
LE: loop exit
PB: predicated region body
PF: predicated region fallthrough
CT: control target
= control target key end

     0   :  { %s2947_s0 = inlined_call_operand.vmem [shape: bf16[8,576], index: 0, kind: input, shape index: {}]   ;;  %s2948_s1 = inlined_call_operand.hbm [shape: bf16[576,576], index: 1, kind: input, shape index: {}]   ;;  %s2949_s2 = inlined_call_operand.vmem [shape: f32[576,1], index: 2, kind: input, shape index: {}]   ;;  %s2950_s3 = inlined_call_operand.<no memory space> [shape: f32[1,1], index: 3, kind: input, shape index: {}]   ;;  %s2951_s4 = inlined_call_operand.vmem [shape: f32[8,1], index: 4, kind: output, shape index: {}]  }
   0x1   :  { %v9_v0 = vstv %s2950_s3 }
   0x2   :  { %10 = vst [vmem:[#allocation2] sm:$0x1] %v9_v0 }
   0x3   :  { %11 = vsyncpa [#allocation4], 0  ;;  %s2629_s17 = smov [#allocation3]   ;;  %s2605_s21 = scalar_lea.hbm %s2948_s1, 23040 }
   0x4   :  { %s19_s18 = sshll.u32 %s2629_s17, 4  ;;  %p2606_p0 = scmp.ne.s32.totalorder %s2948_s1, %s2605_s21  ;;  %s20_s18 = int_to_ptr.vmem [resolvable:$true] %s19_s18 }
   0x5   :  { %p2609_p1 = scmp.lt.u32.totalorder %s2605_s21, %s2948_s1 }
   0x7   :  { %p2611_p2 = pnand %p2609_p1, %p2606_p0 }
   0x9   :  { %2614 = shalt.err (!%p2611_p2)
}
   0xa   :  { %s2615_s3 = scalar_lea.vmem %s20_s18, 23040  ;;  %p2620_p4 = scmp.lt.s32.totalorder %s20_s18, %s20_s18 }
   0xb   :  { %p2616_p3 = scmp.ne.s32.totalorder %s20_s18, %s2615_s3  ;;  %p2621_p5 = scmp.lt.s32.totalorder %s2615_s3, %s2615_s3 }
   0xd   :  { %p2622_p6 = por %p2621_p5, %p2620_p4 }
   0xf   :  { %p2623_p7 = pnand %p2622_p6, %p2616_p3 }
  0x11   :  { %2626 = shalt.err (!%p2623_p7)
}
  0x12   :  { %s2630_s26 = smov 320   ;;  %s2631_s27 = smov 20  }
  0x13   :  { %25 = dma.hbm_to_vmem [thread:$0]  %s2948_s1, 23040, %s20_s18, [#allocation4], %s2630_s26, %s2630_s26, %s2631_s27  }
  0x14   :  { %2627 = dma.done.wait [#allocation4], 23040  }
  0x15   :  { %2628 = vsyncadd [#allocation4], 4294944256  ;;  %v2348_v1 = vld [vmem:[#allocation3 + $0x4] ss:$20 sps:$4 sm:$0xff]   ;;  %v2350_v2 = vld [vmem:[#allocation3 + $0xc] ss:$20 sps:$4 sm:$0xff]  }
  0x16   :  { %1210 = vmatprep.subr.bf16.mxu0 %v2348_v1  ;;  %v2352_v3 = vld [vmem:[#allocation3] ss:$20 sps:$4 sm:$0xff]   ;;  %v2353_v4 = vld [vmem:[#allocation3 + $0x8] ss:$20 sps:$4 sm:$0xff]   ;;  %1333 = vmatprep.subr.bf16.mxu1 %v2350_v2  ;;  %v2359_v8 = vld [vmem:[#allocation3 + $0x30] ss:$20 sps:$4 sm:$0xff]  }
  0x17   :  { %v2354_v5 = vld [vmem:[#allocation3 + $0x2c] ss:$20 sps:$4 sm:$0xff]   ;;  %1211 = vmatpush1.bf16.msra.mxu0 %v2352_v3  ;;  %1334 = vmatpush1.bf16.msra.mxu1 %v2353_v4  ;;  %v2356_v6 = vld [vmem:[#allocation3 + $0x34] ss:$20 sps:$4 sm:$0xff]   ;;  %v2362_v10 = vld [vmem:[#allocation3 + $0x5c] ss:$20 sps:$4 sm:$0xff]  }
  0x18   :  { %v2358_v7 = vld [vmem:[#allocation3 + $0x28] ss:$20 sps:$4 sm:$0xff]   ;;  %1212 = vmatprep.subr.bf16.mxu0 %v2354_v5  ;;  %1335 = vmatprep.subr.bf16.mxu1 %v2356_v6  ;;  %v2364_v11 = vld [vmem:[#allocation3 + $0x50] ss:$20 sps:$4 sm:$0xff]   ;;  %v2365_v12 = vld [vmem:[#allocation3 + $0x58] ss:$20 sps:$4 sm:$0xff]  }
  0x19   :  { %v2360_v9 = vld [vmem:[#allocation3 + $0x54] ss:$20 sps:$4 sm:$0xff]   ;;  %v2366_v13 = vld [vmem:[#allocation3 + $0x7c] ss:$20 sps:$4 sm:$0xff]   ;;  %v2368_v14 = vld [vmem:[#allocation3 + $0x84] ss:$20 sps:$4 sm:$0xff]  }
  0x1a   :  { %v2370_v15 = vld [vmem:[#allocation3 + $0x78] ss:$20 sps:$4 sm:$0xff]   ;;  %v2371_v16 = vld [vmem:[#allocation3 + $0x80] ss:$20 sps:$4 sm:$0xff]   ;;  %v2377_v20 = vld [vmem:[#allocation3 + $0xa8] ss:$20 sps:$4 sm:$0xff]  }
  0x1b   :  { %1213 = vmatpush1.bf16.msra.mxu0 %v2358_v7  ;;  %1336 = vmatpush1.bf16.msra.mxu1 %v2359_v8  ;;  %v2372_v17 = vld [vmem:[#allocation3 + $0xa4] ss:$20 sps:$4 sm:$0xff]   ;;  %v2374_v18 = vld [vmem:[#allocation3 + $0xac] ss:$20 sps:$4 sm:$0xff]   ;;  %v2380_v22 = vld [vmem:[#allocation3 + $0xd4] ss:$20 sps:$4 sm:$0xff]  }
  0x1c   :  { %1214 = vmatprep.subr.bf16.mxu0 %v2360_v9  ;;  %1337 = vmatprep.subr.bf16.mxu1 %v2362_v10  ;;  %v2376_v19 = vld [vmem:[#allocation3 + $0xa0] ss:$20 sps:$4 sm:$0xff]   ;;  %v2382_v23 = vld [vmem:[#allocation3 + $0xc8] ss:$20 sps:$4 sm:$0xff]   ;;  %v2383_v24 = vld [vmem:[#allocation3 + $0xd0] ss:$20 sps:$4 sm:$0xff]  }
  0x1d   :  { %v2378_v21 = vld [vmem:[#allocation3 + $0xcc] ss:$20 sps:$4 sm:$0xff]   ;;  %v2384_v25 = vld [vmem:[#allocation3 + $0xf4] ss:$20 sps:$4 sm:$0xff]   ;;  %v2386_v26 = vld [vmem:[#allocation3 + $0xfc] ss:$20 sps:$4 sm:$0xff]  }
  0x1e   :  { %v2388_v27 = vld [vmem:[#allocation3 + $0xf0] ss:$20 sps:$4 sm:$0xff]   ;;  %v2389_v28 = vld [vmem:[#allocation3 + $0xf8] ss:$20 sps:$4 sm:$0xff]   ;;  %v2395_v32 = vld [vmem:[#allocation3 + $0x120] ss:$20 sps:$4 sm:$0xff]  }
  0x1f   :  { %1215 = vmatpush1.bf16.msra.mxu0 %v2364_v11  ;;  %1338 = vmatpush1.bf16.msra.mxu1 %v2365_v12  ;;  %v2390_v29 = vld [vmem:[#allocation3 + $0x11c] ss:$20 sps:$4 sm:$0xff]   ;;  %v2392_v30 = vld [vmem:[#allocation3 + $0x124] ss:$20 sps:$4 sm:$0xff]   ;;  %v2398_v34 = vld [vmem:[#allocation3 + $0x14c] ss:$20 sps:$4 sm:$0xff]  }
  0x20   :  { %1216 = vmatprep.subr.bf16.mxu0 %v2366_v13  ;;  %1339 = vmatprep.subr.bf16.mxu1 %v2368_v14  ;;  %v2394_v31 = vld [vmem:[#allocation3 + $0x118] ss:$20 sps:$4 sm:$0xff]   ;;  %v2400_v35 = vld [vmem:[#allocation3 + $0x140] ss:$20 sps:$4 sm:$0xff]   ;;  %v2401_v36 = vld [vmem:[#allocation3 + $0x148] ss:$20 sps:$4 sm:$0xff]  }
  0x21   :  { %v2396_v33 = vld [vmem:[#allocation3 + $0x144] ss:$20 sps:$4 sm:$0xff]   ;;  %v2402_v37 = vld [vmem:[#allocation3 + $0x16c] ss:$20 sps:$4 sm:$0xff]   ;;  %v2404_v38 = vld [vmem:[#allocation3 + $0x174] ss:$20 sps:$4 sm:$0xff]  }
  0x22   :  { %v2406_v39 = vld [vmem:[#allocation3 + $0x168] ss:$20 sps:$4 sm:$0xff]   ;;  %v2407_v40 = vld [vmem:[#allocation3 + $0x170] ss:$20 sps:$4 sm:$0xff]   ;;  %v2413_v44 = vld [vmem:[#allocation3 + $0x198] ss:$20 sps:$4 sm:$0xff]  }
  0x23   :  { %1217 = vmatpush1.bf16.msra.mxu0 %v2370_v15  ;;  %1340 = vmatpush1.bf16.msra.mxu1 %v2371_v16  ;;  %v2408_v41 = vld [vmem:[#allocation3 + $0x194] ss:$20 sps:$4 sm:$0xff]   ;;  %v2410_v42 = vld [vmem:[#allocation3 + $0x19c] ss:$20 sps:$4 sm:$0xff]   ;;  %v2416_v46 = vld [vmem:[#allocation3 + $0x1c4] ss:$20 sps:$4 sm:$0xff]  }
  0x24   :  { %1218 = vmatprep.subr.bf16.mxu0 %v2372_v17  ;;  %1341 = vmatprep.subr.bf16.mxu1 %v2374_v18  ;;  %v2412_v43 = vld [vmem:[#allocation3 + $0x190] ss:$20 sps:$4 sm:$0xff]   ;;  %v2418_v48 = vld [vmem:[#allocation3 + $0x1b8] ss:$20 sps:$4 sm:$0xff]   ;;  %v2419_v50 = vld [vmem:[#allocation3 + $0x1c0] ss:$20 sps:$4 sm:$0xff]  }
  0x25   :  { %v2414_v45 = vld [vmem:[#allocation3 + $0x1bc] ss:$20 sps:$4 sm:$0xff]   ;;  %v2420_v51 = vld [vmem:[#allocation3 + $0x1e4] ss:$20 sps:$4 sm:$0xff]   ;;  %v2422_v52 = vld [vmem:[#allocation3 + $0x1ec] ss:$20 sps:$4 sm:$0xff]  }
  0x26   :  { %v34_v47 = vld [vmem:[%s2947_s0] sm:$0xff]  ;;  %v2428_v56 = vld [vmem:[#allocation3 + $0x214] ss:$20 sps:$4 sm:$0xff]   ;;  %v2437_v62 = vld [vmem:[#allocation3 + $0x238] ss:$20 sps:$4 sm:$0xff]   ;;  %vm1206_vm0 = vcmask 523264  }
  0x27   :  { %1219 = vmatpush1.bf16.msra.mxu0 %v2376_v19  ;;  %1342 = vmatpush1.bf16.msra.mxu1 %v2377_v20  ;;  %v2679_v49 = vcombine.high %v34_v47, %v34_v47  ;;  %v2424_v53 = vld [vmem:[#allocation3 + $0x1e0] ss:$20 sps:$4 sm:$0xff]   ;;  %v2425_v54 = vld [vmem:[#allocation3 + $0x1e8] ss:$20 sps:$4 sm:$0xff]   ;;  %v2431_v58 = vld [vmem:[#allocation3 + $0x210] ss:$20 sps:$4 sm:$0xff]   ;;  %v2683_v6 = vcombine.low %v34_v47, %v34_v47 }
  0x28   :  { %1220 = vmatprep.subr.bf16.mxu0 %v2378_v21  ;;  %1343 = vmatprep.subr.bf16.mxu1 %v2380_v22  ;;  %v2426_v55 = vld [vmem:[#allocation3 + $0x20c] ss:$20 sps:$4 sm:$0xff]   ;;  %v2430_v57 = vld [vmem:[#allocation3 + $0x208] ss:$20 sps:$4 sm:$0xff]   ;;  %v2436_v61 = vld [vmem:[#allocation3 + $0x230] ss:$20 sps:$4 sm:$0xff]  }
  0x29   :  { %1242 = vmatprep.mubr.bf16.mxu0 %v2679_v49  ;;  %1365 = vmatprep.mubr.bf16.mxu1 %v2679_v49  ;;  %v2432_v59 = vld [vmem:[#allocation3 + $0x234] ss:$20 sps:$4 sm:$0xff]   ;;  %v2434_v60 = vld [vmem:[#allocation3 + $0x23c] ss:$20 sps:$4 sm:$0xff]   ;;  %v2440_v0 = vld [vmem:[#allocation3 + $0x264] ss:$20 sps:$4 sm:$0xff]  }
  0x2a   :  { %v2438_v63 = vld [vmem:[#allocation3 + $0x25c] ss:$20 sps:$4 sm:$0xff]   ;;  %v2442_v1 = vld [vmem:[#allocation3 + $0x258] ss:$20 sps:$4 sm:$0xff]   ;;  %v2443_v2 = vld [vmem:[#allocation3 + $0x260] ss:$20 sps:$4 sm:$0xff]  }
  0x2b   :  { %1221 = vmatpush1.bf16.msra.mxu0 %v2382_v23  ;;  %1344 = vmatpush1.bf16.msra.mxu1 %v2383_v24  ;;  %v2447_v3 = vld [vmem:[#allocation3 + $0x284] ss:$20 sps:$4 sm:$0xff]   ;;  %v2450_v4 = vld [vmem:[#allocation3 + $0x28c] ss:$20 sps:$4 sm:$0xff]   ;;  %v2448_v7 = vld [vmem:[#allocation3 + $0x288] ss:$20 sps:$4 sm:$0xff]  }
  0x2c   :  { %1222 = vmatprep.subr.bf16.mxu0 %v2384_v25  ;;  %1345 = vmatprep.subr.bf16.mxu1 %v2386_v26  ;;  %v2445_v5 = vld [vmem:[#allocation3 + $0x280] ss:$20 sps:$4 sm:$0xff]   ;;  %v2452_v10 = vld [vmem:[#allocation3 + $0x2a8] ss:$20 sps:$4 sm:$0xff]   ;;  %v2455_v11 = vld [vmem:[#allocation3 + $0x2b0] ss:$20 sps:$4 sm:$0xff]  }
  0x2d   :  { %v2454_v8 = vld [vmem:[#allocation3 + $0x2ac] ss:$20 sps:$4 sm:$0xff]   ;;  %v2457_v9 = vld [vmem:[#allocation3 + $0x2b4] ss:$20 sps:$4 sm:$0xff]   ;;  %v2463_v13 = vld [vmem:[#allocation3 + $0x2dc] ss:$20 sps:$4 sm:$0xff]  }
  0x2e   :  { %v2460_v12 = vld [vmem:[#allocation3 + $0x2d4] ss:$20 sps:$4 sm:$0xff]   ;;  %v2458_v14 = vld [vmem:[#allocation3 + $0x2d0] ss:$20 sps:$4 sm:$0xff]   ;;  %v2461_v15 = vld [vmem:[#allocation3 + $0x2d8] ss:$20 sps:$4 sm:$0xff]  }
  0x2f   :  { %1223 = vmatpush1.bf16.msra.mxu0 %v2388_v27  ;;  %1346 = vmatpush1.bf16.msra.mxu1 %v2389_v28  ;;  %v2466_v16 = vld [vmem:[#allocation3 + $0x2fc] ss:$20 sps:$4 sm:$0xff]   ;;  %v2469_v17 = vld [vmem:[#allocation3 + $0x304] ss:$20 sps:$4 sm:$0xff]   ;;  %v2467_v19 = vld [vmem:[#allocation3 + $0x300] ss:$20 sps:$4 sm:$0xff]  }
  0x30   :  { %1224 = vmatprep.subr.bf16.mxu0 %v2390_v29  ;;  %1347 = vmatprep.subr.bf16.mxu1 %v2392_v30  ;;  %v2464_v18 = vld [vmem:[#allocation3 + $0x2f8] ss:$20 sps:$4 sm:$0xff]   ;;  %v2470_v22 = vld [vmem:[#allocation3 + $0x320] ss:$20 sps:$4 sm:$0xff]   ;;  %v2473_v23 = vld [vmem:[#allocation3 + $0x328] ss:$20 sps:$4 sm:$0xff]  }
  0x31   :  { %v2472_v20 = vld [vmem:[#allocation3 + $0x324] ss:$20 sps:$4 sm:$0xff]   ;;  %v2475_v21 = vld [vmem:[#allocation3 + $0x32c] ss:$20 sps:$4 sm:$0xff]   ;;  %v2481_v25 = vld [vmem:[#allocation3 + $0x354] ss:$20 sps:$4 sm:$0xff]  }
  0x32   :  { %v2478_v24 = vld [vmem:[#allocation3 + $0x34c] ss:$20 sps:$4 sm:$0xff]   ;;  %v2476_v26 = vld [vmem:[#allocation3 + $0x348] ss:$20 sps:$4 sm:$0xff]   ;;  %v2479_v27 = vld [vmem:[#allocation3 + $0x350] ss:$20 sps:$4 sm:$0xff]  }
  0x33   :  { %1225 = vmatpush1.bf16.msra.mxu0 %v2394_v31  ;;  %1348 = vmatpush1.bf16.msra.mxu1 %v2395_v32  ;;  %v2484_v28 = vld [vmem:[#allocation3 + $0x374] ss:$20 sps:$4 sm:$0xff]   ;;  %v2487_v29 = vld [vmem:[#allocation3 + $0x37c] ss:$20 sps:$4 sm:$0xff]   ;;  %vm2634_vm1 = vmmov 0   ;;  %vm1893_vm2 = vcmask 7168  }
  0x34   :  { %1226 = vmatprep.subr.bf16.mxu0 %v2396_v33  ;;  %1349 = vmatprep.subr.bf16.mxu1 %v2398_v34  ;;  %v2690_v30 = vld [vmem:[%s2947_s0 + $0x8] sm:$0xff]  ;;  %v2490_v34 = vld [vmem:[#allocation3 + $0x39c] ss:$20 sps:$4 sm:$0xff]  }
  0x35   :  { %v2694_v31 = vcombine.high %v2690_v30, %v2690_v30  ;;  %v2482_v32 = vld [vmem:[#allocation3 + $0x370] ss:$20 sps:$4 sm:$0xff]   ;;  %v2485_v33 = vld [vmem:[#allocation3 + $0x378] ss:$20 sps:$4 sm:$0xff]  }
  0x36   :  { %v2511_v47 = vld [vmem:[#allocation3 + $0x41c] ss:$20 sps:$4 sm:$0xff]  }
  0x37   :  { %1227 = vmatpush1.bf16.msra.mxu0 %v2400_v35  ;;  %1350 = vmatpush1.bf16.msra.mxu1 %v2401_v36  ;;  %v2493_v35 = vld [vmem:[#allocation3 + $0x3a4] ss:$20 sps:$4 sm:$0xff]  }
  0x38   :  { %1228 = vmatprep.subr.bf16.mxu0 %v2402_v37  ;;  %1351 = vmatprep.subr.bf16.mxu1 %v2404_v38  ;;  %v2488_v36 = vld [vmem:[#allocation3 + $0x398] ss:$20 sps:$4 sm:$0xff]   ;;  %v2491_v37 = vld [vmem:[#allocation3 + $0x3a0] ss:$20 sps:$4 sm:$0xff]  }
  0x39   :  { %v2496_v38 = vld [vmem:[#allocation3 + $0x3c4] ss:$20 sps:$4 sm:$0xff]  }
  0x3b   :  { %1229 = vmatpush1.bf16.msra.mxu0 %v2406_v39  ;;  %1352 = vmatpush1.bf16.msra.mxu1 %v2407_v40  ;;  %v2499_v39 = vld [vmem:[#allocation3 + $0x3cc] ss:$20 sps:$4 sm:$0xff]  }
  0x3c   :  { %1230 = vmatprep.subr.bf16.mxu0 %v2408_v41  ;;  %1353 = vmatprep.subr.bf16.mxu1 %v2410_v42  ;;  %v2494_v40 = vld [vmem:[#allocation3 + $0x3c0] ss:$20 sps:$4 sm:$0xff]   ;;  %v2497_v41 = vld [vmem:[#allocation3 + $0x3c8] ss:$20 sps:$4 sm:$0xff]  }
  0x3d   :  { %v2502_v42 = vld [vmem:[#allocation3 + $0x3ec] ss:$20 sps:$4 sm:$0xff]  }
  0x3f   :  { %1231 = vmatpush1.bf16.msra.mxu0 %v2412_v43  ;;  %1354 = vmatpush1.bf16.msra.mxu1 %v2413_v44  ;;  %v2505_v43 = vld [vmem:[#allocation3 + $0x3f4] ss:$20 sps:$4 sm:$0xff]  }
  0x40   :  { %1232 = vmatprep.subr.bf16.mxu0 %v2414_v45  ;;  %1355 = vmatprep.subr.bf16.mxu1 %v2416_v46  ;;  %v2500_v44 = vld [vmem:[#allocation3 + $0x3e8] ss:$20 sps:$4 sm:$0xff]   ;;  %v2503_v45 = vld [vmem:[#allocation3 + $0x3f0] ss:$20 sps:$4 sm:$0xff]  }
  0x41   :  { %v2508_v46 = vld [vmem:[#allocation3 + $0x414] ss:$20 sps:$4 sm:$0xff]  }
  0x43   :  { %1233 = vmatpush1.bf16.msra.mxu0 %v2418_v48  ;;  %1356 = vmatpush1.bf16.msra.mxu1 %v2419_v50  ;;  %v2506_v48 = vld [vmem:[#allocation3 + $0x410] ss:$20 sps:$4 sm:$0xff]   ;;  %v2509_v50 = vld [vmem:[#allocation3 + $0x418] ss:$20 sps:$4 sm:$0xff]  }
  0x44   :  { %1234 = vmatprep.subr.bf16.mxu0 %v2420_v51  ;;  %1357 = vmatprep.subr.bf16.mxu1 %v2422_v52  ;;  %v2514_v51 = vld [vmem:[#allocation3 + $0x43c] ss:$20 sps:$4 sm:$0xff]   ;;  %v2517_v52 = vld [vmem:[#allocation3 + $0x444] ss:$20 sps:$4 sm:$0xff]  }
  0x47   :  { %1235 = vmatpush1.bf16.msra.mxu0 %v2424_v53  ;;  %1358 = vmatpush1.bf16.msra.mxu1 %v2425_v54  ;;  %v2512_v53 = vld [vmem:[#allocation3 + $0x438] ss:$20 sps:$4 sm:$0xff]   ;;  %v2515_v54 = vld [vmem:[#allocation3 + $0x440] ss:$20 sps:$4 sm:$0xff]  }
  0x48   :  { %1236 = vmatprep.subr.bf16.mxu0 %v2426_v55  ;;  %1359 = vmatprep.subr.bf16.mxu1 %v2428_v56  ;;  %v2520_v55 = vld [vmem:[#allocation3 + $0x464] ss:$20 sps:$4 sm:$0xff]   ;;  %v2523_v56 = vld [vmem:[#allocation3 + $0x46c] ss:$20 sps:$4 sm:$0xff]  }
  0x4b   :  { %1237 = vmatpush1.bf16.msra.mxu0 %v2430_v57  ;;  %1360 = vmatpush1.bf16.msra.mxu1 %v2431_v58  ;;  %v2518_v57 = vld [vmem:[#allocation3 + $0x460] ss:$20 sps:$4 sm:$0xff]   ;;  %v2521_v58 = vld [vmem:[#allocation3 + $0x468] ss:$20 sps:$4 sm:$0xff]  }
  0x4c   :  { %1238 = vmatprep.subr.bf16.mxu0 %v2432_v59  ;;  %1361 = vmatprep.subr.bf16.mxu1 %v2434_v60  ;;  %v2526_v59 = vld [vmem:[#allocation3 + $0x48c] ss:$20 sps:$4 sm:$0xff]   ;;  %v2529_v60 = vld [vmem:[#allocation3 + $0x494] ss:$20 sps:$4 sm:$0xff]  }
  0x4f   :  { %1239 = vmatpush1.bf16.msra.mxu0 %v2436_v61  ;;  %1362 = vmatpush1.bf16.msra.mxu1 %v2437_v62  ;;  %v2524_v61 = vld [vmem:[#allocation3 + $0x488] ss:$20 sps:$4 sm:$0xff]   ;;  %v2527_v62 = vld [vmem:[#allocation3 + $0x490] ss:$20 sps:$4 sm:$0xff]  }
  0x50   :  { %1240 = vmatprep.subr.bf16.mxu0 %v2438_v63  ;;  %1363 = vmatprep.subr.bf16.mxu1 %v2440_v0  ;;  %v2532_v63 = vld [vmem:[#allocation3 + $0x4b4] ss:$20 sps:$4 sm:$0xff]   ;;  %v2535_v0 = vld [vmem:[#allocation3 + $0x4bc] ss:$20 sps:$4 sm:$0xff]  }
  0x53   :  { %1241 = vmatpush1.bf16.msra.mxu0 %v2442_v1  ;;  %1364 = vmatpush1.bf16.msra.mxu1 %v2443_v2  ;;  %v2530_v1 = vld [vmem:[#allocation3 + $0x4b0] ss:$20 sps:$4 sm:$0xff]   ;;  %v2533_v2 = vld [vmem:[#allocation3 + $0x4b8] ss:$20 sps:$4 sm:$0xff]  }
  0x54   :  { %1251 = vmatprep.subr.bf16.mxu0 %v2447_v3  ;;  %1374 = vmatprep.subr.bf16.mxu1 %v2450_v4  ;;  %v2538_v3 = vld [vmem:[#allocation3 + $0x4dc] ss:$20 sps:$4 sm:$0xff]   ;;  %v2541_v4 = vld [vmem:[#allocation3 + $0x4e4] ss:$20 sps:$4 sm:$0xff]  }
  0x56   :  { %1243 = vmatmul.mubr.bf16.vlgmr.msra.gmra.mrb[0].mxu0 %v2683_v6  ;;  %1366 = vmatmul.mubr.bf16.vlgmr.msra.gmra.mrb[0].mxu1 %v2683_v6 }
  0x57   :  { %1252 = vmatpush1.bf16.msra.mxu0 %v2445_v5  ;;  %1375 = vmatpush1.bf16.msra.mxu1 %v2448_v7  ;;  %v2536_v5 = vld [vmem:[#allocation3 + $0x4d8] ss:$20 sps:$4 sm:$0xff]   ;;  %v2539_v7 = vld [vmem:[#allocation3 + $0x4e0] ss:$20 sps:$4 sm:$0xff]  }
  0x58   :  { %1253 = vmatprep.subr.bf16.mxu0 %v2454_v8  ;;  %1376 = vmatprep.subr.bf16.mxu1 %v2457_v9  ;;  %v2546_v8 = vld [vmem:[#allocation3 + $0x504] ss:$20 sps:$4 sm:$0xff]   ;;  %v2549_v9 = vld [vmem:[#allocation3 + $0x50c] ss:$20 sps:$4 sm:$0xff]  }
  0x59   :  { %1283 = vmatprep.mubr.bf16.mxu0 %v2694_v31  ;;  %1406 = vmatprep.mubr.bf16.mxu1 %v2694_v31 }
  0x5b   :  { %1254 = vmatpush1.bf16.msra.mxu0 %v2452_v10  ;;  %1377 = vmatpush1.bf16.msra.mxu1 %v2455_v11  ;;  %v2544_v10 = vld [vmem:[#allocation3 + $0x500] ss:$20 sps:$4 sm:$0xff]   ;;  %v2700_v11 = vcombine.low %v2690_v30, %v2690_v30  ;;  %v2572_v30 = vld [vmem:[#allocation3 + $0x290] ss:$20 sps:$4 sm:$0xff]  }
  0x5c   :  { %1255 = vmatprep.subr.bf16.mxu0 %v2460_v12  ;;  %1378 = vmatprep.subr.bf16.mxu1 %v2463_v13  ;;  %v2547_v12 = vld [vmem:[#allocation3 + $0x508] ss:$20 sps:$4 sm:$0xff]   ;;  %v2552_v13 = vld [vmem:[#allocation3 + $0x52c] ss:$20 sps:$4 sm:$0xff]  }
  0x5f   :  { %1256 = vmatpush1.bf16.msra.mxu0 %v2458_v14  ;;  %1379 = vmatpush1.bf16.msra.mxu1 %v2461_v15  ;;  %v2555_v14 = vld [vmem:[#allocation3 + $0x534] ss:$20 sps:$4 sm:$0xff]  }
  0x60   :  { %1257 = vmatprep.subr.bf16.mxu0 %v2466_v16  ;;  %1380 = vmatprep.subr.bf16.mxu1 %v2469_v17  ;;  %v2550_v15 = vld [vmem:[#allocation3 + $0x528] ss:$20 sps:$4 sm:$0xff]   ;;  %v2553_v16 = vld [vmem:[#allocation3 + $0x530] ss:$20 sps:$4 sm:$0xff]  }
  0x61   :  { %v2558_v17 = vld [vmem:[#allocation3 + $0x554] ss:$20 sps:$4 sm:$0xff]  }
  0x63   :  { %1258 = vmatpush1.bf16.msra.mxu0 %v2464_v18  ;;  %1381 = vmatpush1.bf16.msra.mxu1 %v2467_v19  ;;  %v2561_v18 = vld [vmem:[#allocation3 + $0x55c] ss:$20 sps:$4 sm:$0xff]   ;;  %v2632_v19 = vmov 0  }
  0x64   :  { %1259 = vmatprep.subr.bf16.mxu0 %v2472_v20  ;;  %1382 = vmatprep.subr.bf16.mxu1 %v2475_v21  ;;  %v2556_v20 = vld [vmem:[#allocation3 + $0x550] ss:$20 sps:$4 sm:$0xff]   ;;  %v2559_v21 = vld [vmem:[#allocation3 + $0x558] ss:$20 sps:$4 sm:$0xff]  }
  0x67   :  { %1260 = vmatpush1.bf16.msra.mxu0 %v2470_v22  ;;  %1383 = vmatpush1.bf16.msra.mxu1 %v2473_v23  ;;  %v2564_v22 = vld [vmem:[#allocation3 + $0x57c] ss:$20 sps:$4 sm:$0xff]   ;;  %v2567_v23 = vld [vmem:[#allocation3 + $0x584] ss:$20 sps:$4 sm:$0xff]  }
  0x68   :  { %1261 = vmatprep.subr.bf16.mxu0 %v2478_v24  ;;  %1384 = vmatprep.subr.bf16.mxu1 %v2481_v25  ;;  %v2562_v24 = vld [vmem:[#allocation3 + $0x578] ss:$20 sps:$4 sm:$0xff]   ;;  %v2565_v25 = vld [vmem:[#allocation3 + $0x580] ss:$20 sps:$4 sm:$0xff]  }
  0x6b   :  { %1262 = vmatpush1.bf16.msra.mxu0 %v2476_v26  ;;  %1385 = vmatpush1.bf16.msra.mxu1 %v2479_v27  ;;  %v2569_v26 = vld [vmem:[#allocation3 + $0x150] ss:$20 sps:$4 sm:$0xff]  }
  0x6c   :  { %1263 = vmatprep.subr.bf16.mxu0 %v2484_v28  ;;  %1386 = vmatprep.subr.bf16.mxu1 %v2487_v29  ;;  %v2570_v27 = vld [vmem:[#allocation3 + $0x3d0] ss:$20 sps:$4 sm:$0xff]   ;;  %v2707_v28 = vld [vmem:[%s2947_s0 + $0x10] ss:$0 sps:$4 sm:$0xff]  }
  0x6d   :  { %v2571_v29 = vld [vmem:[#allocation3 + $0x10] ss:$20 sps:$4 sm:$0xff]  }
  0x6f   :  { %1264 = vmatpush1.bf16.msra.mxu0 %v2482_v32  ;;  %1387 = vmatpush1.bf16.msra.mxu1 %v2485_v33  ;;  %v2573_v32 = vld [vmem:[#allocation3 + $0x178] ss:$20 sps:$4 sm:$0xff]  }
  0x70   :  { %1265 = vmatprep.subr.bf16.mxu0 %v2490_v34  ;;  %1388 = vmatprep.subr.bf16.mxu1 %v2493_v35  ;;  %v2574_v33 = vld [vmem:[#allocation3 + $0x3f8] ss:$20 sps:$4 sm:$0xff]  }
  0x71   :  { %v2575_v34 = vld [vmem:[#allocation3 + $0x38] ss:$20 sps:$4 sm:$0xff]  }
  0x72   :  { %v2576_v35 = vld [vmem:[#allocation3 + $0x2b8] ss:$20 sps:$4 sm:$0xff]  }
  0x73   :  { %1266 = vmatpush1.bf16.msra.mxu0 %v2488_v36  ;;  %1389 = vmatpush1.bf16.msra.mxu1 %v2491_v37  ;;  %v2577_v36 = vld [vmem:[#allocation3 + $0x1a0] ss:$20 sps:$4 sm:$0xff]  }
  0x74   :  { %1267 = vmatprep.subr.bf16.mxu0 %v2496_v38  ;;  %1390 = vmatprep.subr.bf16.mxu1 %v2499_v39  ;;  %v2578_v37 = vld [vmem:[#allocation3 + $0x420] ss:$20 sps:$4 sm:$0xff]  }
  0x75   :  { %v2579_v38 = vld [vmem:[#allocation3 + $0x60] ss:$20 sps:$4 sm:$0xff]  }
  0x76   :  { %v2580_v39 = vld [vmem:[#allocation3 + $0x2e0] ss:$20 sps:$4 sm:$0xff]  }
  0x77   :  { %1268 = vmatpush1.bf16.msra.mxu0 %v2494_v40  ;;  %1391 = vmatpush1.bf16.msra.mxu1 %v2497_v41  ;;  %v2581_v40 = vld [vmem:[#allocation3 + $0x1c8] ss:$20 sps:$4 sm:$0xff]  }
  0x78   :  { %1269 = vmatprep.subr.bf16.mxu0 %v2502_v42  ;;  %1392 = vmatprep.subr.bf16.mxu1 %v2505_v43  ;;  %v2582_v41 = vld [vmem:[#allocation3 + $0x448] ss:$20 sps:$4 sm:$0xff]  }
  0x79   :  { %v2583_v42 = vld [vmem:[#allocation3 + $0x88] ss:$20 sps:$4 sm:$0xff]  }
  0x7a   :  { %v2584_v43 = vld [vmem:[#allocation3 + $0x308] ss:$20 sps:$4 sm:$0xff]  }
  0x7b   :  { %1270 = vmatpush1.bf16.msra.mxu0 %v2500_v44  ;;  %1393 = vmatpush1.bf16.msra.mxu1 %v2503_v45  ;;  %v2585_v44 = vld [vmem:[#allocation3 + $0x1f0] ss:$20 sps:$4 sm:$0xff]  }
  0x7c   :  { %1271 = vmatprep.subr.bf16.mxu0 %v2508_v46  ;;  %1394 = vmatprep.subr.bf16.mxu1 %v2511_v47  ;;  %v2586_v45 = vld [vmem:[#allocation3 + $0x470] ss:$20 sps:$4 sm:$0xff]   ;;  %v2589_v46 = vld [vmem:[#allocation3 + $0x218] ss:$20 sps:$4 sm:$0xff]  }
  0x7d   :  { %v2590_v47 = vld [vmem:[#allocation3 + $0x498] ss:$20 sps:$4 sm:$0xff]  }
  0x7f   :  { %1272 = vmatpush1.bf16.msra.mxu0 %v2506_v48  ;;  %1395 = vmatpush1.bf16.msra.mxu1 %v2509_v50  ;;  %v2591_v48 = vld [vmem:[#allocation3 + $0xd8] ss:$20 sps:$4 sm:$0xff]  }
  0x80   :  { %1273 = vmatprep.subr.bf16.mxu0 %v2514_v51  ;;  %1396 = vmatprep.subr.bf16.mxu1 %v2517_v52  ;;  %v2592_v50 = vld [vmem:[#allocation3 + $0x358] ss:$20 sps:$4 sm:$0xff]   ;;  %v2593_v51 = vld [vmem:[#allocation3 + $0x240] ss:$20 sps:$4 sm:$0xff]  }
  0x81   :  { %v2594_v52 = vld [vmem:[#allocation3 + $0x4c0] ss:$20 sps:$4 sm:$0xff]  }
  0x83   :  { %1274 = vmatpush1.bf16.msra.mxu0 %v2512_v53  ;;  %1397 = vmatpush1.bf16.msra.mxu1 %v2515_v54  ;;  %v2595_v53 = vld [vmem:[#allocation3 + $0x100] ss:$20 sps:$4 sm:$0xff]  }
  0x84   :  { %1275 = vmatprep.subr.bf16.mxu0 %v2520_v55  ;;  %1398 = vmatprep.subr.bf16.mxu1 %v2523_v56  ;;  %v2596_v54 = vld [vmem:[#allocation3 + $0x380] ss:$20 sps:$4 sm:$0xff]   ;;  %v2597_v55 = vld [vmem:[#allocation3 + $0x268] ss:$20 sps:$4 sm:$0xff]  }
  0x85   :  { %v2598_v56 = vld [vmem:[#allocation3 + $0x4e8] ss:$20 sps:$4 sm:$0xff]  }
  0x87   :  { %1276 = vmatpush1.bf16.msra.mxu0 %v2518_v57  ;;  %1399 = vmatpush1.bf16.msra.mxu1 %v2521_v58  ;;  %v1617_v57 = vld [vmem:[%s2949_s2 + $0x80] sm:$0xff]  ;;  %v1618_v58 = vld [vmem:[%s2949_s2 + $0x88] sm:$0xff] }
  0x88   :  { %1277 = vmatprep.subr.bf16.mxu0 %v2526_v59  ;;  %1400 = vmatprep.subr.bf16.mxu1 %v2529_v60  ;;  %v2599_v59 = vld [vmem:[#allocation3 + $0x128] ss:$20 sps:$4 sm:$0xff]  }
  0x89   :  { %v2600_v60 = vld [vmem:[#allocation3 + $0x3a8] ss:$20 sps:$4 sm:$0xff]  }
  0x8b   :  { %1278 = vmatpush1.bf16.msra.mxu0 %v2524_v61  ;;  %1401 = vmatpush1.bf16.msra.mxu1 %v2527_v62  ;;  %v2249_v61 = vpack.c.bf16 %v1618_v58, %v1617_v57  ;;  %v1601_v62 = vld [vmem:[%s2949_s2] sm:$0xff]  ;;  %v1642_v58 = vld [vmem:[%s2949_s2 + $0x148] sm:$0xff] }
  0x8c   :  { %1279 = vmatprep.subr.bf16.mxu0 %v2532_v63  ;;  %1402 = vmatprep.subr.bf16.mxu1 %v2535_v0  ;;  %v1602_v63 = vld [vmem:[%s2949_s2 + $0x8] sm:$0xff]  ;;  %v1619_v0 = vld [vmem:[%s2949_s2 + $0x90] sm:$0xff]  ;;  %v1641_v57 = vld [vmem:[%s2949_s2 + $0x140] sm:$0xff] }
  0x8f   :  { %1280 = vmatpush1.bf16.msra.mxu0 %v2530_v1  ;;  %1403 = vmatpush1.bf16.msra.mxu1 %v2533_v2  ;;  %v1620_v1 = vld [vmem:[%s2949_s2 + $0x98] sm:$0xff]  ;;  %v2601_v2 = vld [vmem:[#allocation3 + $0x510] ss:$20 sps:$4 sm:$0xff]  }
  0x90   :  { %1281 = vmatprep.subr.bf16.mxu0 %v2538_v3  ;;  %1404 = vmatprep.subr.bf16.mxu1 %v2541_v4  ;;  %v2633_v3 = vmov 0.0   ;;  %v2251_v4 = vpack.c.bf16 %v1602_v63, %v1601_v62  ;;  %v1659_v62 = vld [vmem:[%s2949_s2 + $0x1d0] sm:$0xff] }
  0x93   :  { %1282 = vmatpush1.bf16.msra.mxu0 %v2536_v5  ;;  %1405 = vmatpush1.bf16.msra.mxu1 %v2539_v7  ;;  %v2253_v5 = vpack.c.bf16 %v1620_v1, %v1619_v0  ;;  %v1603_v7 = vld [vmem:[%s2949_s2 + $0x10] sm:$0xff]  ;;  %v1660_v0 = vld [vmem:[%s2949_s2 + $0x1d8] sm:$0xff] }
  0x94   :  { %1292 = vmatprep.subr.bf16.mxu0 %v2546_v8  ;;  %1415 = vmatprep.subr.bf16.mxu1 %v2549_v9  ;;  %v1604_v8 = vld [vmem:[%s2949_s2 + $0x18] sm:$0xff]  ;;  %v1621_v9 = vld [vmem:[%s2949_s2 + $0xa0] sm:$0xff]  ;;  %v1611_v1 = vld [vmem:[%s2949_s2 + $0x50] sm:$0xff] }
  0x96   :  { %1284 = vmatmul.mubr.bf16.vlgmr.msra.gmra.mrb[0].mxu0 %v2700_v11  ;;  %1407 = vmatmul.mubr.bf16.vlgmr.msra.gmra.mrb[0].mxu1 %v2700_v11 }
  0x97   :  { %1293 = vmatpush1.bf16.msra.mxu0 %v2544_v10  ;;  %1416 = vmatpush1.bf16.msra.mxu1 %v2547_v12  ;;  %v1622_v10 = vld [vmem:[%s2949_s2 + $0xa8] sm:$0xff] }
  0x98   :  { %1294 = vmatprep.subr.bf16.mxu0 %v2552_v13  ;;  %1417 = vmatprep.subr.bf16.mxu1 %v2555_v14  ;;  %v2602_v12 = vld [vmem:[#allocation3 + $0x538] ss:$20 sps:$4 sm:$0xff]   ;;  %v1605_v13 = vld [vmem:[%s2949_s2 + $0x20] sm:$0xff] }
  0x99   :  { %1324 = vmatprep.mubr.bf16.mxu0 %v2632_v19  ;;  %1447 = vmatprep.mubr.bf16.mxu1 %v2632_v19  ;;  %v1606_v14 = vld [vmem:[%s2949_s2 + $0x28] sm:$0xff] }
  0x9a   :  { %v2259_v19 = vpack.c.bf16 %v1606_v14, %v1605_v13  ;;  %v1662_v13 = vld [vmem:[%s2949_s2 + $0x1e8] sm:$0xff]  ;;  %v1613_v14 = vld [vmem:[%s2949_s2 + $0x60] sm:$0xff] }
  0x9b   :  { %1295 = vmatpush1.bf16.msra.mxu0 %v2550_v15  ;;  %1418 = vmatpush1.bf16.msra.mxu1 %v2553_v16  ;;  %v1623_v15 = vld [vmem:[%s2949_s2 + $0xb0] sm:$0xff]  ;;  %v1624_v16 = vld [vmem:[%s2949_s2 + $0xb8] sm:$0xff] }
  0x9c   :  { %1296 = vmatprep.subr.bf16.mxu0 %v2558_v17  ;;  %1419 = vmatprep.subr.bf16.mxu1 %v2561_v18  ;;  %v2603_v17 = vld [vmem:[#allocation3 + $0x560] ss:$20 sps:$4 sm:$0xff]  }
  0x9d   :  { %v1649_v18 = vld [vmem:[%s2949_s2 + $0x180] sm:$0xff] }
  0x9f   :  { %1297 = vmatpush1.bf16.msra.mxu0 %v2556_v20  ;;  %1420 = vmatpush1.bf16.msra.mxu1 %v2559_v21  ;;  %v1650_v20 = vld [vmem:[%s2949_s2 + $0x188] sm:$0xff]  ;;  %v2261_v21 = vpack.c.bf16 %v1624_v16, %v1623_v15 }
  0xa0   :  { %1298 = vmatprep.subr.bf16.mxu0 %v2564_v22  ;;  %1421 = vmatprep.subr.bf16.mxu1 %v2567_v23  ;;  %v1607_v22 = vld [vmem:[%s2949_s2 + $0x30] sm:$0xff]  ;;  %v1608_v23 = vld [vmem:[%s2949_s2 + $0x38] sm:$0xff]  ;;  %v1614_v15 = vld [vmem:[%s2949_s2 + $0x68] sm:$0xff] }
  0xa3   :  { %1299 = vmatpush1.bf16.msra.mxu0 %v2562_v24  ;;  %1422 = vmatpush1.bf16.msra.mxu1 %v2565_v25  ;;  %v1625_v24 = vld [vmem:[%s2949_s2 + $0xc0] sm:$0xff]  ;;  %v1626_v25 = vld [vmem:[%s2949_s2 + $0xc8] sm:$0xff] }
  0xa4   :  { %2090 = vmatprep.subr.bf16.mxu0 %v2569_v26  ;;  %2112 = vmatprep.subr.bf16.mxu1 %v2570_v27  ;;  %v2604_v26 = vld [vmem:[#allocation3 + $0x588] ss:$20 sps:$4 sm:$0xff]   ;;  %v2281_v27 = vpack.c.bf16 %v1650_v20, %v1649_v18 }
  0xa5   :  { %v1645_v18 = vld [vmem:[%s2949_s2 + $0x160] sm:$0xff] }
  0xa6   :  { %2085 = vmatmul.mubr.msk.bf16.vlgmr.msra.gmra.mrb[0].mxu0 %vm1206_vm0, %v2707_v28  ;;  %2086 = vmatmul.mubr.msk.bf16.vlgmr.msra.gmra.mrb[0].mxu1 %vm1206_vm0, %v2707_v28 }
  0xa7   :  { %2091 = vmatpush3.bf16.msra.mxu0 %v2571_v29  ;;  %2113 = vmatpush3.bf16.msra.mxu1 %v2572_v30  ;;  %v1633_v29 = vld [vmem:[%s2949_s2 + $0x100] sm:$0xff]  ;;  %v1634_v30 = vld [vmem:[%s2949_s2 + $0x108] sm:$0xff] }
  0xa8   :  { %2092 = vmatprep.subr.bf16.mxu0 %v2573_v32  ;;  %2114 = vmatprep.subr.bf16.mxu1 %v2574_v33  ;;  %v1651_v32 = vld [vmem:[%s2949_s2 + $0x190] sm:$0xff]  ;;  %v2263_v33 = vpack.c.bf16 %v1608_v23, %v1607_v22  ;;  %v1632_v22 = vld [vmem:[%s2949_s2 + $0xf8] sm:$0xff] }
  0xa9   :  { %1488 = vmatprep.mubr.bf16.mxu0 %v2679_v49  ;;  %1528 = vmatprep.mubr.bf16.mxu1 %v2694_v31  ;;  %v2587_v49 = vld [vmem:[#allocation3 + $0xb0] ss:$20 sps:$4 sm:$0xff]  }
  0xaa   :  { %v2588_v31 = vld [vmem:[#allocation3 + $0x330] ss:$20 sps:$4 sm:$0xff]  }
  0xab   :  { %2093 = vmatpush3.bf16.msra.mxu0 %v2575_v34  ;;  %2115 = vmatpush3.bf16.msra.mxu1 %v2576_v35  ;;  %v1652_v34 = vld [vmem:[%s2949_s2 + $0x198] sm:$0xff]  ;;  %v2265_v35 = vpack.c.bf16 %v1626_v25, %v1625_v24  ;;  %v1663_v23 = vld [vmem:[%s2949_s2 + $0x1f0] sm:$0xff] }
  0xac   :  { %2094 = vmatprep.subr.bf16.mxu0 %v2577_v36  ;;  %2116 = vmatprep.subr.bf16.mxu1 %v2578_v37  ;;  %v1609_v36 = vld [vmem:[%s2949_s2 + $0x40] sm:$0xff]  ;;  %v1610_v37 = vld [vmem:[%s2949_s2 + $0x48] sm:$0xff]  ;;  %v1664_v25 = vld [vmem:[%s2949_s2 + $0x1f8] sm:$0xff] }
  0xaf   :  { %2095 = vmatpush3.bf16.msra.mxu0 %v2579_v38  ;;  %2117 = vmatpush3.bf16.msra.mxu1 %v2580_v39  ;;  %v2283_v38 = vpack.c.bf16 %v1634_v30, %v1633_v29  ;;  %v2285_v39 = vpack.c.bf16 %v1652_v34, %v1651_v32  ;;  %v2309_v29 = vpack.c.bf16 %v1664_v25, %v1663_v23  ;;  %v1647_v32 = vld [vmem:[%s2949_s2 + $0x170] sm:$0xff] }
  0xb0   :  { %2096 = vmatprep.subr.bf16.mxu0 %v2581_v40  ;;  %2118 = vmatprep.subr.bf16.mxu1 %v2582_v41  ;;  %v1635_v40 = vld [vmem:[%s2949_s2 + $0x110] sm:$0xff]  ;;  %v1636_v41 = vld [vmem:[%s2949_s2 + $0x118] sm:$0xff] }
  0xb3   :  { %2097 = vmatpush3.bf16.msra.mxu0 %v2583_v42  ;;  %2119 = vmatpush3.bf16.msra.mxu1 %v2584_v43  ;;  %v2267_v42 = vpack.c.bf16 %v1610_v37, %v1609_v36  ;;  %v1653_v43 = vld [vmem:[%s2949_s2 + $0x1a0] sm:$0xff] }
  0xb4   :  { %2098 = vmatprep.subr.bf16.mxu0 %v2585_v44  ;;  %2120 = vmatprep.subr.bf16.mxu1 %v2586_v45  ;;  %v1654_v44 = vld [vmem:[%s2949_s2 + $0x1a8] sm:$0xff]  ;;  %v2287_v45 = vpack.c.bf16 %v1636_v41, %v1635_v40 }
  0xb7   :  { %2099 = vmatpush3.bf16.msra.mxu0 %v2587_v49  ;;  %2121 = vmatpush3.bf16.msra.mxu1 %v2588_v31  ;;  %v2289_v49 = vpack.c.bf16 %v1654_v44, %v1653_v43  ;;  %v1637_v31 = vld [vmem:[%s2949_s2 + $0x120] sm:$0xff] }
  0xb8   :  { %2100 = vmatprep.subr.bf16.mxu0 %v2589_v46  ;;  %2122 = vmatprep.subr.bf16.mxu1 %v2590_v47  ;;  %v1638_v46 = vld [vmem:[%s2949_s2 + $0x128] sm:$0xff]  ;;  %v1655_v47 = vld [vmem:[%s2949_s2 + $0x1b0] sm:$0xff] }
  0xbb   :  { %2101 = vmatpush3.bf16.msra.mxu0 %v2591_v48  ;;  %2123 = vmatpush3.bf16.msra.mxu1 %v2592_v50  ;;  %v2291_v48 = vpack.c.bf16 %v1638_v46, %v1637_v31 }
  0xbc   :  { %2102 = vmatprep.subr.bf16.mxu0 %v2593_v51  ;;  %2124 = vmatprep.subr.bf16.mxu1 %v2594_v52  ;;  %v1639_v51 = vld [vmem:[%s2949_s2 + $0x130] sm:$0xff]  ;;  %v1640_v52 = vld [vmem:[%s2949_s2 + $0x138] sm:$0xff] }
  0xbf   :  { %2103 = vmatpush3.bf16.msra.mxu0 %v2595_v53  ;;  %2125 = vmatpush3.bf16.msra.mxu1 %v2596_v54  ;;  %v1657_v53 = vld [vmem:[%s2949_s2 + $0x1c0] sm:$0xff]  ;;  %v1658_v54 = vld [vmem:[%s2949_s2 + $0x1c8] sm:$0xff] }
  0xc0   :  { %2104 = vmatprep.subr.bf16.mxu0 %v2597_v55  ;;  %2126 = vmatprep.subr.bf16.mxu1 %v2598_v56  ;;  %v2295_v55 = vpack.c.bf16 %v1640_v52, %v1639_v51  ;;  %v2297_v56 = vpack.c.bf16 %v1658_v54, %v1657_v53 }
  0xc3   :  { %2105 = vmatpush3.bf16.msra.mxu0 %v2599_v59  ;;  %2127 = vmatpush3.bf16.msra.mxu1 %v2600_v60  ;;  %v2299_v59 = vpack.c.bf16 %v1642_v58, %v1641_v57  ;;  %v1627_v60 = vld [vmem:[%s2949_s2 + $0xd0] sm:$0xff]  ;;  %v1666_v57 = vld [vmem:[%s2949_s2 + $0x208] sm:$0xff] }
  0xc4   :  { %2218 = vmatprep.subr.bf16.mxu0 %v2633_v3  ;;  %2250 = vmatprep.subr.bf16.mxu1 %v2249_v61  ;;  %v1628_v61 = vld [vmem:[%s2949_s2 + $0xd8] sm:$0xff] }
  0xc5   :  { %v2269_v63 = vpack.c.bf16 %v1628_v61, %v1627_v60 }
  0xc6   :  { %1489 = vmatmul.mubr.bf16.vlgmr.msra.gmra.mrb[4].mxu0 %v2683_v6  ;;  %1529 = vmatmul.mubr.bf16.vlgmr.msra.gmra.mrb[4].mxu1 %v2700_v11  ;;  %v2255_v6 = vpack.c.bf16 %v1604_v8, %v1603_v7  ;;  %v2257_v11 = vpack.c.bf16 %v1622_v10, %v1621_v9  ;;  %v1643_v7 = vld [vmem:[%s2949_s2 + $0x150] sm:$0xff]  ;;  %v1644_v8 = vld [vmem:[%s2949_s2 + $0x158] sm:$0xff]  ;;  %v1629_v10 = vld [vmem:[%s2949_s2 + $0xe0] sm:$0xff] }
  0xc7   :  { %2219 = vmatpush3.bf16.msra.mxu0 %v2601_v2  ;;  %2226 = vmatprep.mubr.msk.bf16.mxu0 %vm2634_vm1, %v2633_v3  ;;  %v1612_v2 = vld [vmem:[%s2949_s2 + $0x58] sm:$0xff]  ;;  %v2303_v9 = vpack.c.bf16 %v1644_v8, %v1643_v7  ;;  %v1670_v7 = vld [vmem:[%s2949_s2 + $0x228] sm:$0xff] }
  0xc8   :  { %2220 = vmatprep.subr.bf16.mxu0 %v2633_v3  ;;  %2252 = vmatpush3.bf16.msra.mxu1 %v2251_v4  ;;  %v2301_v4 = vpack.c.bf16 %v1660_v0, %v1659_v62 }
  0xc9   :  { %2254 = vmatprep.subr.bf16.mxu1 %v2253_v5  ;;  %v2271_v5 = vpack.c.bf16 %v1612_v2, %v1611_v1  ;;  %v1667_v1 = vld [vmem:[%s2949_s2 + $0x210] sm:$0xff]  ;;  %v1668_v2 = vld [vmem:[%s2949_s2 + $0x218] sm:$0xff] }
  0xcb   :  { %2221 = vmatpush3.bf16.msra.mxu0 %v2602_v12  ;;  %v1630_v12 = vld [vmem:[%s2949_s2 + $0xe8] sm:$0xff] }
  0xcc   :  { %2222 = vmatprep.subr.bf16.mxu0 %v2633_v3  ;;  %2256 = vmatpush3.bf16.msra.mxu1 %v2255_v6  ;;  %v1661_v6 = vld [vmem:[%s2949_s2 + $0x1e0] sm:$0xff] }
  0xcd   :  { %2258 = vmatprep.subr.bf16.mxu1 %v2257_v11  ;;  %v2273_v11 = vpack.c.bf16 %v1630_v12, %v1629_v10  ;;  %v2305_v16 = vpack.c.bf16 %v1662_v13, %v1661_v6 }
  0xcf   :  { %2223 = vmatpush3.bf16.msra.mxu0 %v2603_v17  ;;  %v2275_v17 = vpack.c.bf16 %v1614_v15, %v1613_v14 }
  0xd0   :  { %2224 = vmatprep.subr.bf16.mxu0 %v2633_v3  ;;  %2260 = vmatpush3.bf16.msra.mxu1 %v2259_v19  ;;  %v1646_v19 = vld [vmem:[%s2949_s2 + $0x168] sm:$0xff] }
  0xd1   :  { %2262 = vmatprep.subr.bf16.mxu1 %v2261_v21  ;;  %v2307_v20 = vpack.c.bf16 %v1646_v19, %v1645_v18  ;;  %v1631_v21 = vld [vmem:[%s2949_s2 + $0xf0] sm:$0xff] }
  0xd2   :  { %v2277_v24 = vpack.c.bf16 %v1632_v22, %v1631_v21 }
  0xd3   :  { %2225 = vmatpush3.bf16.msra.mxu0 %v2604_v26  ;;  %v1615_v26 = vld [vmem:[%s2949_s2 + $0x70] sm:$0xff] }
  0xd4   :  { %2282 = vmatprep.subr.bf16.mxu0 %v2281_v27  ;;  %2264 = vmatpush3.bf16.msra.mxu1 %v2263_v33  ;;  %v1616_v27 = vld [vmem:[%s2949_s2 + $0x78] sm:$0xff] }
  0xd5   :  { %2266 = vmatprep.subr.bf16.mxu1 %v2265_v35  ;;  %v2279_v30 = vpack.c.bf16 %v1616_v27, %v1615_v26  ;;  %v1648_v33 = vld [vmem:[%s2949_s2 + $0x178] sm:$0xff]  ;;  %v2635_v35 = vmov 0.0|0.0  }
  0xd6   :  { %2227 = vmatmul.mubr.msk.bf16.vlgmr.msra.gmra.mrb[8].mxu0 %vm1206_vm0, %v2707_v28  ;;  %v1656_v28 = vld [vmem:[%s2949_s2 + $0x1b8] sm:$0xff]  ;;  %v2311_v34 = vpack.c.bf16 %v1648_v33, %v1647_v32 }
  0xd7   :  { %2284 = vmatpush3.bf16.msra.mxu0 %v2283_v38  ;;  %v2293_v50 = vpack.c.bf16 %v1656_v28, %v1655_v47 }
  0xd8   :  { %2286 = vmatprep.subr.bf16.mxu0 %v2285_v39  ;;  %2268 = vmatpush3.bf16.msra.mxu1 %v2267_v42 }
  0xd9   :  { %2270 = vmatprep.subr.bf16.mxu1 %v2269_v63 }
  0xdb   :  { %2288 = vmatpush3.bf16.msra.mxu0 %v2287_v45 }
  0xdc   :  { %2290 = vmatprep.subr.bf16.mxu0 %v2289_v49  ;;  %2272 = vmatpush3.bf16.msra.mxu1 %v2271_v5  ;;  %v1669_v5 = vld [vmem:[%s2949_s2 + $0x220] sm:$0xff] }
  0xdd   :  { %2274 = vmatprep.subr.bf16.mxu1 %v2273_v11  ;;  %v2320_v8 = vpack.c.bf16 %v1670_v7, %v1669_v5 }
  0xdf   :  { %2292 = vmatpush3.bf16.msra.mxu0 %v2291_v48 }
  0xe0   :  { %2294 = vmatprep.subr.bf16.mxu0 %v2293_v50  ;;  %2276 = vmatpush3.bf16.msra.mxu1 %v2275_v17 }
  0xe1   :  { %2278 = vmatprep.subr.bf16.mxu1 %v2277_v24 }
  0xe3   :  { %2296 = vmatpush3.bf16.msra.mxu0 %v2295_v55 }
  0xe4   :  { %2298 = vmatprep.subr.bf16.mxu0 %v2297_v56  ;;  %2280 = vmatpush3.bf16.msra.mxu1 %v2279_v30  ;;  %v1665_v56 = vld [vmem:[%s2949_s2 + $0x200] sm:$0xff] }
  0xe5   :  { %2313 = vmatprep.subr.bf16.mxu1 %v2635_v35  ;;  %v2314_v62 = vpack.c.bf16 %v1666_v57, %v1665_v56 }
  0xe7   :  { %2300 = vmatpush3.bf16.msra.mxu0 %v2299_v59 }
  0xe8   :  { %2302 = vmatprep.subr.bf16.mxu0 %v2301_v4  ;;  %v2317_v4 = vpack.c.bf16 %v1668_v2, %v1667_v1 }
  0xeb   :  { %2304 = vmatpush3.bf16.msra.mxu0 %v2303_v9  ;;  %v1671_v9 = vld [vmem:[%s2949_s2 + $0x230] sm:$0xff] }
  0xec   :  { %2306 = vmatprep.subr.bf16.mxu0 %v2305_v16 }
  0xef   :  { %2308 = vmatpush3.bf16.msra.mxu0 %v2307_v20 }
  0xf0   :  { %2310 = vmatprep.subr.bf16.mxu0 %v2309_v29 }
  0xf3   :  { %2312 = vmatpush3.bf16.msra.mxu0 %v2311_v34 }
 0x179   :  { %v1326_v36 = vpop.f32.mrb[0].mxu0  ;;  %v1449_v37 = vpop.f32.mrb[0].mxu1 }
 0x17a   :  { %v1576_v38 = vadd.f32 3.0, %v1326_v36  ;;  %v1578_v39 = vadd.f32 3.0, %v1449_v37  ;;  %v1328_v40 = vpop.f32.mrb[1].mxu0  ;;  %v1451_v41 = vpop.f32.mrb[1].mxu1 }
 0x17b   :  { %v1577_v42 = vadd.f32 3.0, %v1328_v40  ;;  %v1579_v43 = vadd.f32 3.0, %v1451_v41  ;;  %v1330_v44 = vpop.f32.mrb[2].mxu0  ;;  %v1453_v45 = vpop.f32.mrb[2].mxu1 }
 0x17c   :  { %v1581_v49 = vmax.f32 %v1576_v38, 0.0  ;;  %v1583_v31 = vmax.f32 %v1578_v39, 0.0  ;;  %v1331_v46 = vpop.f32.mrb[3].mxu0  ;;  %v1454_v47 = vpop.f32.mrb[3].mxu1 }
 0x17d   :  { %v1582_v28 = vmax.f32 %v1577_v42, 0.0  ;;  %v1584_v48 = vmax.f32 %v1579_v43, 0.0 }
 0x17e   :  { %v1586_v50 = vmin.f32 %v1581_v49, 6.0  ;;  %v1588_v51 = vmin.f32 %v1583_v31, 6.0 }
 0x17f   :  { %v1587_v52 = vmin.f32 %v1582_v28, 6.0  ;;  %v1589_v53 = vmin.f32 %v1584_v48, 6.0 }
 0x180   :  { %v1591_v54 = vmul.f32 %v1586_v50, %v1326_v36  ;;  %v1593_v55 = vmul.f32 %v1588_v51, %v1449_v37 }
 0x181   :  { %v1592_v58 = vmul.f32 %v1587_v52, %v1328_v40  ;;  %v1594_v59 = vmul.f32 %v1589_v53, %v1451_v41 }
 0x182   :  { %v1596_v63 = vmul.f32 0.16666667, %v1591_v54  ;;  %v1598_v0 = vmul.f32 0.16666667, %v1593_v55 }
 0x183   :  { %v1597_v60 = vmul.f32 0.16666667, %v1592_v58  ;;  %v1599_v61 = vmul.f32 0.16666667, %v1594_v59 }
 0x185   :  { %1747 = vmatprep.mubr.f32.mxu1 %v1597_v60  ;;  %1817 = vmatprep.mubr.f32.mxu0 %v1599_v61 }
 0x186   :  { %1748 = vmatmul.mubr.f32.vlgmr.msra.gmra.mrb[8].mxu1 %v1596_v63  ;;  %1818 = vmatmul.mubr.f32.vlgmr.msra.gmra.mrb[12].mxu0 %v1598_v0 }
 0x187   :  { %2315 = vmatpush3.bf16.msra.mxu1 %v2314_v62  ;;  %2246 = vmatprep.mubr.msk.f32.mxu1 %vm2634_vm1, %v2633_v3  ;;  %v1672_v3 = vld [vmem:[%s2949_s2 + $0x238] sm:$0xff] }
 0x188   :  { %2316 = vmatprep.subr.bf16.mxu1 %v2635_v35  ;;  %v2323_v10 = vpack.c.bf16 %v1672_v3, %v1671_v9 }
 0x18b   :  { %2318 = vmatpush3.bf16.msra.mxu1 %v2317_v4 }
 0x18c   :  { %2319 = vmatprep.subr.bf16.mxu1 %v2635_v35 }
 0x18f   :  { %2321 = vmatpush3.bf16.msra.mxu1 %v2320_v8 }
 0x190   :  { %2322 = vmatprep.subr.bf16.mxu1 %v2635_v35  ;;  %v2088_v35 = vld [vmem:[#allocation2] ss:$0 sm:$0xff] }
 0x193   :  { %2324 = vmatpush3.bf16.msra.mxu1 %v2323_v10 }
 0x199   :  { %v2106_v12 = vpop.f32.mrb[4].mxu0  ;;  %v2128_v6 = vpop.f32.mrb[4].mxu1 }
 0x19a   :  { %v2107_v11 = vpop.f32.mrb[5].mxu0  ;;  %v2129_v13 = vpop.f32.mrb[5].mxu1 }
 0x19b   :  { %v2108_v14 = vadd.f32 %v2107_v11, %v2106_v12  ;;  %v2130_v15 = vadd.f32 %v2129_v13, %v2128_v6  ;;  %v2109_v16 = vpop.f32.mrb[6].mxu0  ;;  %v2131_v17 = vpop.f32.mrb[6].mxu1 }
 0x19c   :  { %v2110_v18 = vpop.f32.mrb[7].mxu0  ;;  %v2132_v19 = vpop.f32.mrb[7].mxu1 }
 0x19d   :  { %v1531_v20 = vadd.f32 %v2130_v15, %v2108_v14 }
 0x1a9   :  { %v1570_v21 = vpop.f32.mrb[8].mxu0 }
 0x1aa   :  { %v1571_v22 = vadd.f32 %v1570_v21, %v1531_v20  ;;  %v2228_v23 = vpop.f32.mrb[9].mxu0 }
 0x1ab   :  { %v1573_v24 = vpop.f32.mrb[10].mxu0 }
 0x1ac   :  { %v1580_v25 = vadd.f32 3.0, %v1571_v22  ;;  %v2229_v26 = vpop.f32.mrb[11].mxu0 }
 0x1ae   :  { %v1585_v27 = vmax.f32 %v1580_v25, 0.0 }
 0x1b0   :  { %v1590_v29 = vmin.f32 %v1585_v27, 6.0 }
 0x1b2   :  { %v1595_v30 = vmul.f32 %v1590_v29, %v1571_v22 }
 0x1b4   :  { %v1600_v32 = vmul.f32 0.16666667, %v1595_v30 }
 0x1b6   :  { %2247 = vmatmul.mubr.msk.f32.vlgmr.msra.gmra.mrb[10].mxu1 %vm1206_vm0, %v1600_v32 }
 0x259   :  { %v2171_v33 = vpop.f32.mrb[8].mxu1  ;;  %v2206_v34 = vpop.f32.mrb[12].mxu0 }
 0x25a   :  { %v2172_v36 = vpop.f32.mrb[9].mxu1  ;;  %v2207_v37 = vpop.f32.mrb[13].mxu0 }
 0x25b   :  { %v2173_v38 = vadd.f32 %v2172_v36, %v2171_v33  ;;  %v2208_v39 = vadd.f32 %v2207_v37, %v2206_v34 }
 0x25d   :  { %v1750_v40 = vadd.f32 %v2173_v38, %v2088_v35 }
 0x25f   :  { %v1820_v41 = vadd.f32 %v2208_v39, %v1750_v40 }
 0x289   :  { %v1889_v42 = vpop.f32.mrb[10].mxu1 }
 0x28a   :  { %v1890_v43 = vadd.f32 %v1889_v42, %v1820_v41  ;;  %v2248_v44 = vpop.f32.mrb[11].mxu1 }
 0x28c   :  { %1894 = vst.msk [vmem:[%s2951_s4] sm:$0xff] %vm1893_vm2, %v1890_v43 }
 0x28d   :  { %1899 = vsyncpa [#allocation4], 1 }

</bundles_post_ra>
